<compile_context>
chip_gen: v7x
topology: tpu7x:2x2x1
jax: 0.10.0
libtpu: 0.0.40
codegen_flags: <defaults>
</compile_context>

<pallas_src>
import jax
import jax.numpy as jnp
from jax.experimental import pallas as pl
from jax.experimental.pallas import tpu as pltpu


def dqn_kernel(x_ref, w1_ref, b1_ref, w2_ref, b2_ref, w3_ref, b3_ref, o_ref):
    # fc1 + relu: MXU matmul (bf16 operands, f32 accumulation); bias/relu on VPU in f32.
    h1 = jnp.dot(x_ref[...], w1_ref[...], preferred_element_type=jnp.float32)
    h1 = jnp.maximum(h1 + b1_ref[...], 0.0)
    # fc2 + relu
    h2 = jnp.dot(h1.astype(w2_ref.dtype), w2_ref[...],
                 preferred_element_type=jnp.float32)
    h2 = jnp.maximum(h2 + b2_ref[...], 0.0)
    # out (no activation); lane-dense (padded-to-128) store.
    o = jnp.dot(h2.astype(w3_ref.dtype), w3_ref[...],
                preferred_element_type=jnp.float32)
    o_ref[...] = (o + b3_ref[...]).astype(o_ref.dtype)


def _round_up(n, m):
    return pl.cdiv(n, m) * m


def _pad_axis(a, axis, size):
    pad = size - a.shape[axis]
    if pad <= 0:
        return a
    widths = [(0, 0)] * a.ndim
    widths[axis] = (0, pad)
    return jnp.pad(a, widths)


def dqn_forward(x, params, *, block_b=512, mxu_dtype=jnp.bfloat16):
    """Fused DQN forward. x: (B, in_states) f32. params: ((w1,b1),(w2,b2),(w3,b3))
    with weights in (F_in, F_out) layout and biases (1, F_out)."""
    (w1, b1), (w2, b2), (w3, b3) = params
    B, in_states = x.shape
    h1_nodes = w1.shape[1]
    h2_nodes = w2.shape[1]
    out_actions = w3.shape[1]

    # Alignment: K 111 -> 128 (lane-aligned contraction), out 3 -> 128 (lane-dense store).
    k_pad = _round_up(in_states, 128)
    n_out_pad = _round_up(out_actions, 128)

    # Batch tile: 512 streaming sweet spot, shrink (sublane-aligned) for tiny B.
    tb = min(block_b, _round_up(B, 8))
    b_pad = _round_up(B, tb)

    # Wrapper-side padding / casts (outside the kernel, zero padding is exact).
    xp = _pad_axis(_pad_axis(x, 1, k_pad), 0, b_pad).astype(mxu_dtype)
    w1p = _pad_axis(w1, 0, k_pad).astype(mxu_dtype)
    w2p = w2.astype(mxu_dtype)
    w3p = _pad_axis(w3, 1, n_out_pad).astype(mxu_dtype)
    b1p = b1.astype(jnp.float32)
    b2p = b2.astype(jnp.float32)
    b3p = _pad_axis(b3, 1, n_out_pad).astype(jnp.float32)

    const = lambda i: (0, 0)  # weights/biases: same block every grid step -> fetched once
    grid = (b_pad // tb,)

    out = pl.pallas_call(
        dqn_kernel,
        out_shape=jax.ShapeDtypeStruct((b_pad, n_out_pad), jnp.float32),
        grid_spec=pltpu.PrefetchScalarGridSpec(
            num_scalar_prefetch=0,
            grid=grid,
            in_specs=[
                pl.BlockSpec((tb, k_pad), lambda i: (i, 0)),      # x: streamed per tile
                pl.BlockSpec((k_pad, h1_nodes), const),           # w1
                pl.BlockSpec((1, h1_nodes), const),               # b1
                pl.BlockSpec((h1_nodes, h2_nodes), const),        # w2
                pl.BlockSpec((1, h2_nodes), const),               # b2
                pl.BlockSpec((h2_nodes, n_out_pad), const),       # w3 (out-padded)
                pl.BlockSpec((1, n_out_pad), const),              # b3 (out-padded)
            ],
            out_specs=pl.BlockSpec((tb, n_out_pad), lambda i: (i, 0)),
        ),
        compiler_params=pltpu.CompilerParams(
            dimension_semantics=("parallel",),        # shards batch tiles across v7x's 2 TCs
            vmem_limit_bytes=32 * 1024 * 1024,        # safe on v7x (64 MiB physical)
        ),
    )(xp, w1p, b1p, w2p, b2p, w3p, b3p)

    # Slice padding back off.
    return out[:B, :out_actions]


def init_linear(key, fan_in, fan_out):
    # Deterministic init mimicking torch.nn.Linear default:
    # U(-1/sqrt(fan_in), 1/sqrt(fan_in)) for weight and bias.
    kw, kb = jax.random.split(key)
    bound = 1.0 / jnp.sqrt(jnp.float32(fan_in))
    w = jax.random.uniform(kw, (fan_in, fan_out), jnp.float32, -bound, bound)
    b = jax.random.uniform(kb, (1, fan_out), jnp.float32, -bound, bound)
    return w, b


def _reference(x, params):
    (w1, b1), (w2, b2), (w3, b3) = params
    h = jnp.maximum(x @ w1 + b1, 0.0)
    h = jnp.maximum(h @ w2 + b2, 0.0)
    return h @ w3 + b3


if __name__ == "__main__":
    in_states, h1_nodes, h2_nodes, out_actions = 111, 256, 128, 3

    key = jax.random.PRNGKey(0)
    k_x, k_xb, k1, k2, k3 = jax.random.split(key, 5)

    params = (
        init_linear(k1, in_states, h1_nodes),
        init_linear(k2, h1_nodes, h2_nodes),
        init_linear(k3, h2_nodes, out_actions),
    )

    # Small single-state-ish call (B=2), as in the original spec.
    batch = 2
    x = jax.random.normal(k_x, (batch, in_states), jnp.float32)
    out = jax.block_until_ready(dqn_forward(x, params))
    ref = _reference(x, params)
    assert out.shape == (batch, out_actions)
    # bf16 MXU operands -> loosened tolerance vs the f32 reference.
    assert jnp.allclose(out, ref, atol=2e-2, rtol=2e-2), "small-batch mismatch"

    # Larger batched call exercising the batch grid (replay-batch style).
    big_batch = 1024
    xb = jax.random.normal(k_xb, (big_batch, in_states), jnp.float32)
    outb = jax.block_until_ready(dqn_forward(xb, params))
    refb = _reference(xb, params)
    assert outb.shape == (big_batch, out_actions)
    assert jnp.allclose(outb, refb, atol=2e-2, rtol=2e-2), "batched mismatch"

    print("KERNEL_OK")
</pallas_src>

<mosaic_0001>
module attributes {stable_mosaic.version = 11 : i64} {
  func.func @dqn_kernel(%arg0: i32, %arg1: memref<8x128xbf16, #tpu.memory_space<vmem>>, %arg2: memref<128x256xbf16, #tpu.memory_space<vmem>>, %arg3: memref<1x256xf32, #tpu.memory_space<vmem>>, %arg4: memref<256x128xbf16, #tpu.memory_space<vmem>>, %arg5: memref<1x128xf32, #tpu.memory_space<vmem>>, %arg6: memref<128x128xbf16, #tpu.memory_space<vmem>>, %arg7: memref<1x128xf32, #tpu.memory_space<vmem>>, %arg8: memref<8x128xf32, #tpu.memory_space<vmem>>) attributes {dimension_semantics = [#tpu.dimension_semantics<parallel>], iteration_bounds = array<i64: 1>, scalar_prefetch = 0 : i64, scratch_operands = 0 : i64, tpu.core_type = #tpu.core_type<tc>, window_params = [{transform_indices = @transform_0, window_bounds = array<i64: 8, 128>}, {pipeline_mode = #tpu.pipeline_mode<synchronous>, transform_indices = @transform_1, window_bounds = array<i64: 128, 256>}, {pipeline_mode = #tpu.pipeline_mode<synchronous>, transform_indices = @transform_2, window_bounds = array<i64: 1, 256>}, {pipeline_mode = #tpu.pipeline_mode<synchronous>, transform_indices = @transform_3, window_bounds = array<i64: 256, 128>}, {pipeline_mode = #tpu.pipeline_mode<synchronous>, transform_indices = @transform_4, window_bounds = array<i64: 1, 128>}, {pipeline_mode = #tpu.pipeline_mode<synchronous>, transform_indices = @transform_5, window_bounds = array<i64: 128, 128>}, {pipeline_mode = #tpu.pipeline_mode<synchronous>, transform_indices = @transform_6, window_bounds = array<i64: 1, 128>}, {transform_indices = @transform_7, window_bounds = array<i64: 8, 128>}]} {
    %c0 = arith.constant 0 : index
    %c0_0 = arith.constant 0 : index
    %0 = vector.load %arg1[%c0, %c0_0] : memref<8x128xbf16, #tpu.memory_space<vmem>>, vector<8x128xbf16>
    %c0_1 = arith.constant 0 : index
    %c0_2 = arith.constant 0 : index
    %1 = vector.load %arg2[%c0_1, %c0_2] : memref<128x256xbf16, #tpu.memory_space<vmem>>, vector<128x256xbf16>
    %cst = arith.constant dense<0.000000e+00> : vector<8x256xf32>
    %2 = tpu.matmul %0, %1, %cst {dimension_numbers = #tpu.dot_dimension_numbers<[1], [0], [0], [1], [0, 0, 1, 1], [], []>} : vector<8x128xbf16>, vector<128x256xbf16>, vector<8x256xf32> -> vector<8x256xf32>
    %c0_3 = arith.constant 0 : index
    %c0_4 = arith.constant 0 : index
    %3 = vector.load %arg3[%c0_3, %c0_4] : memref<1x256xf32, #tpu.memory_space<vmem>>, vector<1x256xf32>
    %4 = vector.broadcast %3 : vector<1x256xf32> to vector<8x256xf32>
    %5 = arith.addf %2, %4 : vector<8x256xf32>
    %cst_5 = arith.constant 0.000000e+00 : f32
    %6 = vector.broadcast %cst_5 : f32 to vector<8x256xf32>
    %7 = arith.maximumf %5, %6 : vector<8x256xf32>
    %8 = arith.truncf %7 : vector<8x256xf32> to vector<8x256xbf16>
    %c0_6 = arith.constant 0 : index
    %c0_7 = arith.constant 0 : index
    %9 = vector.load %arg4[%c0_6, %c0_7] : memref<256x128xbf16, #tpu.memory_space<vmem>>, vector<256x128xbf16>
    %cst_8 = arith.constant dense<0.000000e+00> : vector<8x128xf32>
    %10 = tpu.matmul %8, %9, %cst_8 {dimension_numbers = #tpu.dot_dimension_numbers<[1], [0], [0], [1], [0, 0, 1, 1], [], []>} : vector<8x256xbf16>, vector<256x128xbf16>, vector<8x128xf32> -> vector<8x128xf32>
    %c0_9 = arith.constant 0 : index
    %c0_10 = arith.constant 0 : index
    %11 = vector.load %arg5[%c0_9, %c0_10] : memref<1x128xf32, #tpu.memory_space<vmem>>, vector<1x128xf32>
    %12 = vector.broadcast %11 : vector<1x128xf32> to vector<8x128xf32>
    %13 = arith.addf %10, %12 : vector<8x128xf32>
    %cst_11 = arith.constant 0.000000e+00 : f32
    %14 = vector.broadcast %cst_11 : f32 to vector<8x128xf32>
    %15 = arith.maximumf %13, %14 : vector<8x128xf32>
    %16 = arith.truncf %15 : vector<8x128xf32> to vector<8x128xbf16>
    %c0_12 = arith.constant 0 : index
    %c0_13 = arith.constant 0 : index
    %17 = vector.load %arg6[%c0_12, %c0_13] : memref<128x128xbf16, #tpu.memory_space<vmem>>, vector<128x128xbf16>
    %cst_14 = arith.constant dense<0.000000e+00> : vector<8x128xf32>
    %18 = tpu.matmul %16, %17, %cst_14 {dimension_numbers = #tpu.dot_dimension_numbers<[1], [0], [0], [1], [0, 0, 1, 1], [], []>} : vector<8x128xbf16>, vector<128x128xbf16>, vector<8x128xf32> -> vector<8x128xf32>
    %c0_15 = arith.constant 0 : index
    %c0_16 = arith.constant 0 : index
    %19 = vector.load %arg7[%c0_15, %c0_16] : memref<1x128xf32, #tpu.memory_space<vmem>>, vector<1x128xf32>
    %20 = vector.broadcast %19 : vector<1x128xf32> to vector<8x128xf32>
    %21 = arith.addf %18, %20 : vector<8x128xf32>
    %c0_17 = arith.constant 0 : index
    %c0_18 = arith.constant 0 : index
    %22 = vector.load %arg8[%c0_17, %c0_18] : memref<8x128xf32, #tpu.memory_space<vmem>>, vector<8x128xf32>
    tpu.vector_store %arg8[%c0_17, %c0_18], %21 {strides = array<i32>} : memref<8x128xf32, #tpu.memory_space<vmem>>, vector<8x128xf32>,
    return
  }
  func.func @transform_0(%arg0: i32) -> (i32, i32) {
    %c0_i32 = arith.constant 0 : i32
    %c0_i32_0 = arith.constant 0 : i32
    return %arg0, %c0_i32 : i32, i32
  }
  func.func @transform_1(%arg0: i32) -> (i32, i32) {
    %c0_i32 = arith.constant 0 : i32
    %c0_i32_0 = arith.constant 0 : i32
    %c0_i32_1 = arith.constant 0 : i32
    return %c0_i32, %c0_i32_0 : i32, i32
  }
  func.func @transform_2(%arg0: i32) -> (i32, i32) {
    %c0_i32 = arith.constant 0 : i32
    %c0_i32_0 = arith.constant 0 : i32
    %c0_i32_1 = arith.constant 0 : i32
    return %c0_i32, %c0_i32_0 : i32, i32
  }
  func.func @transform_3(%arg0: i32) -> (i32, i32) {
    %c0_i32 = arith.constant 0 : i32
    %c0_i32_0 = arith.constant 0 : i32
    %c0_i32_1 = arith.constant 0 : i32
    return %c0_i32, %c0_i32_0 : i32, i32
  }
  func.func @transform_4(%arg0: i32) -> (i32, i32) {
    %c0_i32 = arith.constant 0 : i32
    %c0_i32_0 = arith.constant 0 : i32
    %c0_i32_1 = arith.constant 0 : i32
    return %c0_i32, %c0_i32_0 : i32, i32
  }
  func.func @transform_5(%arg0: i32) -> (i32, i32) {
    %c0_i32 = arith.constant 0 : i32
    %c0_i32_0 = arith.constant 0 : i32
    %c0_i32_1 = arith.constant 0 : i32
    return %c0_i32, %c0_i32_0 : i32, i32
  }
  func.func @transform_6(%arg0: i32) -> (i32, i32) {
    %c0_i32 = arith.constant 0 : i32
    %c0_i32_0 = arith.constant 0 : i32
    %c0_i32_1 = arith.constant 0 : i32
    return %c0_i32, %c0_i32_0 : i32, i32
  }
  func.func @transform_7(%arg0: i32) -> (i32, i32) {
    %c0_i32 = arith.constant 0 : i32
    %c0_i32_0 = arith.constant 0 : i32
    return %arg0, %c0_i32 : i32, i32
  }
}

</mosaic_0001>

<bundles_post_ra>
// kernel: tpu_custom_call.1
= control target key start
LH: loop header
LB: loop body
LE: loop exit
PB: predicated region body
PF: predicated region fallthrough
CT: control target
= control target key end

     0   :  { %12 = vsyncpa [#allocation3], 0  ;;  %s933_s0 = inlined_call_operand.hbm [shape: bf16[8,128], index: 0, kind: input, shape index: {}]   ;;  %s934_s1 = inlined_call_operand.hbm [shape: bf16[128,256], index: 1, kind: input, shape index: {}]   ;;  %s935_s2 = inlined_call_operand.vmem [shape: f32[1,256], index: 2, kind: input, shape index: {}]   ;;  %s936_s3 = inlined_call_operand.hbm [shape: bf16[256,128], index: 3, kind: input, shape index: {}]   ;;  %s937_s4 = inlined_call_operand.vmem [shape: f32[1,128], index: 4, kind: input, shape index: {}]   ;;  %s938_s5 = inlined_call_operand.hbm [shape: bf16[128,128], index: 5, kind: input, shape index: {}]   ;;  %s939_s6 = inlined_call_operand.vmem [shape: f32[1,128], index: 6, kind: input, shape index: {}]   ;;  %s940_s7 = inlined_call_operand.hbm [shape: f32[8,128], index: 7, kind: output, shape index: {}]  }
   0x1   :  { %13 = vsyncpa [#allocation6], 0 }
   0x2   :  { %14 = vsyncpa [#allocation9], 0 }
   0x3   :  { %15 = vsyncpa [#allocation4], 0  ;;  %s812_s24 = smov [#allocation5]   ;;  %s694_s28 = scalar_lea.hbm %s934_s1, 2048 }
   0x4   :  { %s31_s25 = sshll.u32 %s812_s24, 4  ;;  %p695_p0 = scmp.ne.s32.totalorder %s934_s1, %s694_s28  ;;  %s32_s25 = int_to_ptr.vmem [resolvable:$true] %s31_s25 }
   0x5   :  { %p698_p1 = scmp.lt.u32.totalorder %s694_s28, %s934_s1 }
   0x7   :  { %p700_p2 = pnand %p698_p1, %p695_p0 }
   0x9   :  { %703 = shalt.err (!%p700_p2)
}
   0xa   :  { %s704_s10 = scalar_lea.vmem %s32_s25, 2048  ;;  %p709_p4 = scmp.lt.s32.totalorder %s32_s25, %s32_s25 }
   0xb   :  { %p705_p3 = scmp.ne.s32.totalorder %s32_s25, %s704_s10  ;;  %p710_p5 = scmp.lt.s32.totalorder %s704_s10, %s704_s10 }
   0xd   :  { %p711_p6 = por %p710_p5, %p709_p4 }
   0xf   :  { %p712_p7 = pnand %p711_p6, %p705_p3 }
  0x11   :  { %715 = shalt.err (!%p712_p7)
}
  0x12   :  { %s813_s11 = smov 128   ;;  %s814_s12 = smov 8  }
  0x13   :  { %37 = dma.hbm_to_vmem [thread:$0]  %s934_s1, 2048, %s32_s25, [#allocation6], %s813_s11, %s813_s11, %s814_s12  }
  0x14   :  { %s815_s15 = smov [#allocation2]   ;;  %s816_s17 = smov [#allocation7]  }
  0x15   :  { %s22_s16 = sshll.u32 %s815_s15, 4  ;;  %s45_s18 = sshll.u32 %s816_s17, 4  ;;  %s23_s16 = int_to_ptr.vmem [resolvable:$true] %s22_s16  ;;  %s46_s18 = int_to_ptr.vmem [resolvable:$true] %s45_s18 }
  0x16   :  { %s716_s21 = scalar_lea.hbm %s933_s0, 64 }
  0x17   :  { %p717_p8 = scmp.ne.s32.totalorder %s933_s0, %s716_s21  ;;  %p720_p9 = scmp.lt.u32.totalorder %s716_s21, %s933_s0 }
  0x19   :  { %p722_p10 = pnand %p720_p9, %p717_p8 }
  0x1b   :  { %725 = shalt.err (!%p722_p10)
}
  0x1c   :  { %s726_s1 = scalar_lea.vmem %s23_s16, 64  ;;  %p731_p12 = scmp.lt.s32.totalorder %s23_s16, %s23_s16 }
  0x1d   :  { %p727_p11 = scmp.ne.s32.totalorder %s23_s16, %s726_s1  ;;  %p732_p13 = scmp.lt.s32.totalorder %s726_s1, %s726_s1 }
  0x1f   :  { %p733_p0 = por %p732_p13, %p731_p12 }
  0x21   :  { %p734_p1 = pnand %p733_p0, %p727_p11 }
  0x23   :  { %737 = shalt.err (!%p734_p1)
}
  0x24   :  { %25 = dma.hbm_to_vmem [thread:$0]  %s933_s0, 64, %s23_s16, [#allocation3]  }
  0x25   :  { %s738_s30 = scalar_lea.hbm %s936_s3, 2048 }
  0x26   :  { %p739_p2 = scmp.ne.s32.totalorder %s936_s3, %s738_s30  ;;  %p742_p3 = scmp.lt.u32.totalorder %s738_s30, %s936_s3 }
  0x28   :  { %p744_p4 = pnand %p742_p3, %p739_p2 }
  0x2a   :  { %747 = shalt.err (!%p744_p4)
}
  0x2b   :  { %s748_s12 = scalar_lea.vmem %s46_s18, 2048  ;;  %p753_p6 = scmp.lt.s32.totalorder %s46_s18, %s46_s18 }
  0x2c   :  { %p749_p5 = scmp.ne.s32.totalorder %s46_s18, %s748_s12  ;;  %p754_p7 = scmp.lt.s32.totalorder %s748_s12, %s748_s12 }
  0x2e   :  { %p755_p8 = por %p754_p7, %p753_p6 }
  0x30   :  { %p756_p9 = pnand %p755_p8, %p749_p5 }
  0x32   :  { %759 = shalt.err (!%p756_p9)
}
  0x33   :  { %s817_s0 = smov 64   ;;  %s818_s13 = smov 4  }
  0x34   :  { %51 = dma.hbm_to_vmem [thread:$0]  %s936_s3, 2048, %s46_s18, [#allocation6], %s817_s0, %s817_s0, %s818_s13  }
  0x35   :  { %s819_s16 = smov [#allocation8]   ;;  %s760_s21 = scalar_lea.hbm %s938_s5, 1024 }
  0x36   :  { %s59_s17 = sshll.u32 %s819_s16, 4  ;;  %p761_p10 = scmp.ne.s32.totalorder %s938_s5, %s760_s21  ;;  %s60_s17 = int_to_ptr.vmem [resolvable:$true] %s59_s17 }
  0x37   :  { %p764_p11 = scmp.lt.u32.totalorder %s760_s21, %s938_s5 }
  0x39   :  { %p766_p12 = pnand %p764_p11, %p761_p10 }
  0x3b   :  { %769 = shalt.err (!%p766_p12)
}
  0x3c   :  { %s770_s1 = scalar_lea.vmem %s60_s17, 1024  ;;  %p775_p0 = scmp.lt.s32.totalorder %s60_s17, %s60_s17 }
  0x3d   :  { %p771_p13 = scmp.ne.s32.totalorder %s60_s17, %s770_s1  ;;  %p776_p1 = scmp.lt.s32.totalorder %s770_s1, %s770_s1 }
  0x3f   :  { %p777_p2 = por %p776_p1, %p775_p0 }
  0x41   :  { %p778_p3 = pnand %p777_p2, %p771_p13 }
  0x43   :  { %781 = shalt.err (!%p778_p3)
}
  0x44   :  { %65 = dma.hbm_to_vmem [thread:$0]  %s938_s5, 1024, %s60_s17, [#allocation9], %s817_s0, %s817_s0, %s818_s13  }
  0x45   :  { %804 = dma.done.wait [#allocation3], 64  }
  0x46   :  { %805 = vsyncadd [#allocation3], 4294967232 }
  0x47   :  { %806 = dma.done.wait [#allocation6], 4096  }
  0x48   :  { %807 = vsyncadd [#allocation6], 4294963200 }
  0x49   :  { %808 = dma.done.wait [#allocation9], 1024  }
  0x4a   :  { %809 = vsyncadd [#allocation9], 4294966272  ;;  %v820_v0 = vmov 0   ;;  %v646_v1 = vld [vmem:[#allocation5 + $0x4] ss:$8 sps:$4 sm:$0xff]   ;;  %v674_v15 = vld [vmem:[#allocation7 + $0x50] sm:$0xff]   ;;  %v100_v41 = vlaneseq }
  0x4b   :  { %222 = vmatprep.mubr.bf16.mxu0 %v820_v0  ;;  %v648_v2 = vld [vmem:[#allocation5] ss:$8 sps:$4 sm:$0xff]   ;;  %190 = vmatprep.subr.bf16.mxu0 %v646_v1  ;;  %v649_v3 = vld [vmem:[#allocation5 + $0x14] ss:$8 sps:$4 sm:$0xff]   ;;  %v651_v4 = vld [vmem:[#allocation5 + $0x10] ss:$8 sps:$4 sm:$0xff]  }
  0x4c   :  { %191 = vmatpush1.bf16.msra.mxu0 %v648_v2  ;;  %v652_v5 = vld [vmem:[#allocation5 + $0x24] ss:$8 sps:$4 sm:$0xff]   ;;  %v654_v6 = vld [vmem:[#allocation5 + $0x20] ss:$8 sps:$4 sm:$0xff]   ;;  %v655_v7 = vld [vmem:[#allocation5 + $0x34] ss:$8 sps:$4 sm:$0xff]  }
  0x4d   :  { %192 = vmatprep.subr.bf16.mxu0 %v649_v3  ;;  %v657_v8 = vld [vmem:[#allocation5 + $0x30] ss:$8 sps:$4 sm:$0xff]   ;;  %v658_v9 = vld [vmem:[#allocation5 + $0x44] ss:$8 sps:$4 sm:$0xff]   ;;  %v660_v12 = vld [vmem:[#allocation5 + $0x40] ss:$8 sps:$4 sm:$0xff]  }
  0x4e   :  { %v670_v10 = vld [vmem:[#allocation7 + $0x40] sm:$0xff]   ;;  %v672_v13 = vld [vmem:[#allocation7 + $0x48] sm:$0xff]   ;;  %v661_v16 = vld [vmem:[#allocation5 + $0x54] ss:$8 sps:$4 sm:$0xff]   ;;  %v821_v35 = vmov 0.0   ;;  %v101_v42 = vshrl.u32 %v100_v41, 7 }
  0x4f   :  { %v671_v11 = vld [vmem:[#allocation7] sm:$0xff]   ;;  %583 = vmatprep.subr.bf16.mxu1 %v670_v10  ;;  %v673_v14 = vld [vmem:[#allocation7 + $0x8] sm:$0xff]   ;;  %v663_v17 = vld [vmem:[#allocation5 + $0x50] ss:$8 sps:$4 sm:$0xff]   ;;  %vm822_vm0 = vmmov 0   ;;  %s823_s30 = smov [#allocation10]  }
  0x50   :  { %193 = vmatpush1.bf16.msra.mxu0 %v651_v4  ;;  %584 = vmatpush3.bf16.msra.mxu1 %v671_v11  ;;  %v675_v18 = vld [vmem:[#allocation7 + $0x10] sm:$0xff]   ;;  %v676_v19 = vld [vmem:[#allocation7 + $0x58] sm:$0xff]   ;;  %v664_v20 = vld [vmem:[#allocation5 + $0x64] ss:$8 sps:$4 sm:$0xff]   ;;  %v102_v43 = vsub.s32 0, %v101_v42  ;;  %v106_v45 = vsub.s32 1, %v101_v42 }
  0x51   :  { %194 = vmatprep.subr.bf16.mxu0 %v652_v5  ;;  %585 = vmatprep.subr.bf16.mxu1 %v672_v13  ;;  %v666_v21 = vld [vmem:[#allocation5 + $0x60] ss:$8 sps:$4 sm:$0xff]   ;;  %v667_v22 = vld [vmem:[#allocation5 + $0x74] ss:$8 sps:$4 sm:$0xff]   ;;  %v669_v26 = vld [vmem:[#allocation5 + $0x70] ss:$8 sps:$4 sm:$0xff]  }
  0x52   :  { %v677_v23 = vld [vmem:[#allocation7 + $0x18] sm:$0xff]   ;;  %v678_v24 = vld [vmem:[#allocation7 + $0x60] sm:$0xff]   ;;  %v680_v27 = vld [vmem:[#allocation7 + $0x68] sm:$0xff]   ;;  %s530_s8 = sshll.u32 %s823_s30, 4  ;;  %s531_s8 = int_to_ptr.vmem [resolvable:$true] %s530_s8 }
  0x53   :  { %v679_v25 = vld [vmem:[#allocation7 + $0x20] sm:$0xff]   ;;  %v681_v28 = vld [vmem:[#allocation7 + $0x28] sm:$0xff]   ;;  %v81_v29 = vld [vmem:[#allocation2] sm:$0xf]  ;;  %p787_p5 = scmp.lt.s32.totalorder %s531_s8, %s531_s8 }
  0x54   :  { %195 = vmatpush1.bf16.msra.mxu0 %v654_v6  ;;  %586 = vmatpush3.bf16.msra.mxu1 %v673_v14  ;;  %v682_v30 = vld [vmem:[#allocation7 + $0x70] sm:$0xff]   ;;  %v684_v32 = vld [vmem:[#allocation7 + $0x78] sm:$0xff]   ;;  %v686_v34 = vld [vmem:[#allocation8] sm:$0xff]  }
  0x55   :  { %196 = vmatprep.subr.bf16.mxu0 %v655_v7  ;;  %587 = vmatprep.subr.bf16.mxu1 %v674_v15  ;;  %v683_v31 = vld [vmem:[#allocation7 + $0x30] sm:$0xff]   ;;  %v685_v33 = vld [vmem:[#allocation7 + $0x38] sm:$0xff]   ;;  %v687_v36 = vld [vmem:[#allocation8 + $0x8] sm:$0xff]  }
  0x56   :  { %v688_v37 = vld [vmem:[#allocation8 + $0x10] sm:$0xff]   ;;  %v689_v38 = vld [vmem:[#allocation8 + $0x18] sm:$0xff]   ;;  %v690_v39 = vld [vmem:[#allocation8 + $0x20] sm:$0xff]  }
  0x57   :  { %v691_v40 = vld [vmem:[#allocation8 + $0x28] sm:$0xff]   ;;  %v98_v44 = vld [vmem:[%s935_s2] sm:$0x3]  ;;  %v692_v58 = vld [vmem:[#allocation8 + $0x30] sm:$0xff]  }
  0x58   :  { %197 = vmatpush1.bf16.msra.mxu0 %v657_v8  ;;  %588 = vmatpush3.bf16.msra.mxu1 %v675_v18  ;;  %v103_v46 = vrot.slane %v98_v44, %v102_v43  ;;  %v107_v47 = vrot.slane %v98_v44, %v106_v45  ;;  %v693_v59 = vld [vmem:[#allocation8 + $0x38] sm:$0xff]  }
  0x59   :  { %198 = vmatprep.subr.bf16.mxu0 %v658_v9  ;;  %589 = vmatprep.subr.bf16.mxu1 %v676_v19  ;;  %v557_v61 = vld [vmem:[%s937_s4] ss:$0 sm:$0xff]  ;;  %s782_s4 = scalar_lea.vmem %s531_s8, 128 }
  0x5a   :  { %v574_v5 = vld [vmem:[%s939_s6] ss:$0 sm:$0xff]  ;;  %p783_p4 = scmp.ne.s32.totalorder %s531_s8, %s782_s4  ;;  %p788_p6 = scmp.lt.s32.totalorder %s782_s4, %s782_s4 }
  0x5c   :  { %199 = vmatpush1.bf16.msra.mxu0 %v660_v12  ;;  %590 = vmatpush3.bf16.msra.mxu1 %v677_v23  ;;  %p789_p7 = por %p788_p6, %p787_p5 }
  0x5d   :  { %200 = vmatprep.subr.bf16.mxu0 %v661_v16  ;;  %591 = vmatprep.subr.bf16.mxu1 %v678_v24 }
  0x5e   :  { %p790_p8 = pnand %p789_p7, %p783_p4 }
  0x60   :  { %201 = vmatpush1.bf16.msra.mxu0 %v663_v17  ;;  %592 = vmatpush3.bf16.msra.mxu1 %v679_v25 }
  0x61   :  { %202 = vmatprep.subr.bf16.mxu0 %v664_v20  ;;  %593 = vmatprep.subr.bf16.mxu1 %v680_v27 }
  0x64   :  { %203 = vmatpush1.bf16.msra.mxu0 %v666_v21  ;;  %594 = vmatpush3.bf16.msra.mxu1 %v681_v28 }
  0x65   :  { %204 = vmatprep.subr.bf16.mxu0 %v667_v22  ;;  %595 = vmatprep.subr.bf16.mxu1 %v682_v30 }
  0x68   :  { %205 = vmatpush1.bf16.msra.mxu0 %v669_v26  ;;  %596 = vmatpush3.bf16.msra.mxu1 %v683_v31 }
  0x69   :  { %597 = vmatprep.subr.bf16.mxu1 %v684_v32  ;;  %614 = vmatprep.subr.bf16.mxu0 %v821_v35 }
  0x6b   :  { %223 = vmatmul.mubr.bf16.vlgmr.msra.gmra.mrb[0].mxu0 %v81_v29 }
  0x6c   :  { %598 = vmatpush3.bf16.msra.mxu1 %v685_v33  ;;  %615 = vmatpush3.bf16.msra.mxu0 %v686_v34 }
  0x6d   :  { %616 = vmatprep.subr.bf16.mxu0 %v821_v35  ;;  %630 = vmatprep.mubr.msk.bf16.mxu0 %vm822_vm0, %v821_v35 }
  0x70   :  { %617 = vmatpush3.bf16.msra.mxu0 %v687_v36 }
  0x71   :  { %618 = vmatprep.subr.bf16.mxu0 %v821_v35 }
  0x74   :  { %619 = vmatpush3.bf16.msra.mxu0 %v688_v37 }
  0x75   :  { %620 = vmatprep.subr.bf16.mxu0 %v821_v35 }
  0x78   :  { %621 = vmatpush3.bf16.msra.mxu0 %v689_v38 }
  0x79   :  { %622 = vmatprep.subr.bf16.mxu0 %v821_v35 }
  0x7c   :  { %623 = vmatpush3.bf16.msra.mxu0 %v690_v39 }
  0x7d   :  { %624 = vmatprep.subr.bf16.mxu0 %v821_v35 }
  0x80   :  { %625 = vmatpush3.bf16.msra.mxu0 %v691_v40 }
  0x81   :  { %626 = vmatprep.subr.bf16.mxu0 %v821_v35 }
  0x84   :  { %627 = vmatpush3.bf16.msra.mxu0 %v692_v58 }
  0x85   :  { %628 = vmatprep.subr.bf16.mxu0 %v821_v35 }
  0x88   :  { %629 = vmatpush3.bf16.msra.mxu0 %v693_v59 }
 0x13e   :  { %v224_v48 = vpop.f32.mrb[0].mxu0 }
 0x13f   :  { %v225_v49 = vadd.f32 %v224_v48, %v103_v46  ;;  %v226_v50 = vpop.f32.mrb[1].mxu0 }
 0x140   :  { %v227_v51 = vadd.f32 %v226_v50, %v107_v47  ;;  %v228_v52 = vpop.f32.mrb[2].mxu0 }
 0x141   :  { %v231_v53 = vmax.f32 %v225_v49, 0.0  ;;  %v229_v54 = vpop.f32.mrb[3].mxu0 }
 0x142   :  { %v232_v55 = vmax.f32 %v227_v51, 0.0 }
 0x143   :  { %v233_v57 = vpack.c.bf16 %v231_v53, %v231_v53 }
 0x144   :  { %v234_v56 = vpack.c.bf16 %v232_v55, %v232_v55 }
 0x146   :  { %402 = vmatprep.mubr.bf16.mxu1 %v234_v56 }
 0x147   :  { %403 = vmatmul.mubr.bf16.vlgmr.msra.gmra.mrb[0].mxu1 %v233_v57 }
 0x21a   :  { %v599_v60 = vpop.f32.mrb[0].mxu1 }
 0x21b   :  { %v600_v62 = vpop.f32.mrb[1].mxu1 }
 0x21c   :  { %v601_v63 = vadd.f32 %v600_v62, %v599_v60  ;;  %v602_v0 = vpop.f32.mrb[2].mxu1 }
 0x21d   :  { %v603_v1 = vpop.f32.mrb[3].mxu1 }
 0x21e   :  { %v405_v2 = vadd.f32 %v601_v63, %v557_v61 }
 0x220   :  { %v410_v3 = vmax.f32 %v405_v2, 0.0 }
 0x222   :  { %v411_v4 = vpack.c.bf16 %v410_v3, %v410_v3 }
 0x224   :  { %631 = vmatmul.mubr.bf16.vlgmr.msra.gmra.mrb[4].mxu0 %v411_v4 }
 0x2f7   :  { %v517_v6 = vpop.f32.mrb[4].mxu0 }
 0x2f8   :  { %v518_v7 = vadd.f32 %v574_v5, %v517_v6  ;;  %v632_v8 = vpop.f32.mrb[5].mxu0 }
 0x2f9   :  { %v520_v9 = vpop.f32.mrb[6].mxu0 }
 0x2fa   :  { %523 = vst [vmem:[#allocation10] sm:$0xff] %v518_v7  ;;  %v633_v10 = vpop.f32.mrb[7].mxu0 }
 0x2fb   :  { %793 = shalt.err (!%p790_p8)
}
 0x2fc   :  { %s794_s6 = scalar_lea.hbm %s940_s7, 128 }
 0x2fd   :  { %p795_p9 = scmp.ne.s32.totalorder %s940_s7, %s794_s6  ;;  %p798_p10 = scmp.lt.u32.totalorder %s794_s6, %s940_s7 }
 0x2ff   :  { %p800_p11 = pnand %p798_p10, %p795_p9 }
 0x301   :  { %803 = shalt.err (!%p800_p11)
}
 0x302   :  { %533 = dma.vmem_to_hbm [thread:$0]  %s531_s8, 128, %s940_s7, [#allocation4]  }
 0x303   :  { %810 = dma.done.wait [#allocation4], 128  }
 0x304   :  { %811 = vsyncadd [#allocation4], 4294967168 }
 0x305   :  { %537 = vsyncpa [#allocation3], 1 }
 0x306   :  { %538 = vsyncpa [#allocation6], 1 }
 0x307   :  { %539 = vsyncpa [#allocation9], 1 }
 0x308   :  { %540 = vsyncpa [#allocation4], 1 }

</bundles_post_ra>
